<compile_context>
chip_gen: v6e
topology: v6e:2x2x1
jax: 0.10.0
libtpu: 0.0.40
codegen_flags: <defaults>
</compile_context>

<pallas_src>
import functools

import jax
import jax.numpy as jnp
from jax.experimental import pallas as pl
from jax.experimental.pallas import tpu as pltpu

LANE = 128     # vreg lane width (last dim)
SUBLANE = 8    # f32 sublane count (second-to-last dim)


def _round_up(x, m):
    return (x + m - 1) // m * m


def _softplus(x):
    # Numerically stable softplus: max(x, 0) + log1p(exp(-|x|))
    return jnp.maximum(x, 0.0) + jnp.log1p(jnp.exp(-jnp.abs(x)))


# ---------------------------------------------------------------------------
# Pallas kernel: full Actor_Beta forward pass with a fused alpha/beta head.
# ---------------------------------------------------------------------------
def actor_beta_kernel(
    s_ref,                 # (TB, Kp)
    w1_ref, b1_ref,        # (Kp, Hp), (1, Hp)
    w2_ref, b2_ref,        # (Hp, Hp), (1, Hp)
    wh_ref, bh_ref,        # (Hp, Op), (1, Op)   fused [alpha|beta] head
    out_ref,               # (TB, Op)
):
    # fc1 + tanh
    h1 = jnp.tanh(
        jnp.dot(s_ref[...], w1_ref[...], preferred_element_type=jnp.float32)
        + b1_ref[...]
    )
    # fc2 + tanh (cast activation to the weight dtype so bf16 weights hit the
    # bf16 MXU path; no-op when weights are f32)
    h2 = jnp.tanh(
        jnp.dot(h1.astype(w2_ref.dtype), w2_ref[...],
                preferred_element_type=jnp.float32)
        + b2_ref[...]
    )
    # fused alpha/beta head: one matmul, one softplus chain, one wide store
    z = (
        jnp.dot(h2.astype(wh_ref.dtype), wh_ref[...],
                preferred_element_type=jnp.float32)
        + bh_ref[...]
    )
    out_ref[...] = (_softplus(z) + 1.0).astype(out_ref.dtype)


# ---------------------------------------------------------------------------
# Wrapper: pad to hardware tiles, fuse the heads, tile the batch.
# ---------------------------------------------------------------------------
@functools.partial(jax.jit, static_argnames=("block_batch", "use_bf16"))
def actor_beta_forward(s, params, block_batch=256, use_bf16=False):
    w1, b1, w2, b2, wa, ba, wb, bb = params
    B, K = s.shape
    H = w1.shape[1]
    A = wa.shape[1]

    # Lane-dense padded feature dims.
    Kp = _round_up(K, LANE)
    Hp = _round_up(H, LANE)
    Op = _round_up(2 * A, LANE)

    # Batch tiling: tile is a multiple of the f32 sublane count, capped so
    # double-buffered activation/output tiles stay tiny vs. VMEM (v7x: 64 MiB).
    TB = min(_round_up(B, SUBLANE), block_batch)
    Bp = _round_up(B, TB)
    n_tiles = Bp // TB

    def pad2d(x, rows, cols):
        r, c = x.shape
        return jnp.pad(x, ((0, rows - r), (0, cols - c)))

    # Fuse alpha/beta heads: [H, 2A] weight, [1, 2A] bias, then pad.
    wh = jnp.concatenate([wa, wb], axis=1)
    bh = jnp.concatenate([ba, bb], axis=1)

    mm_dtype = jnp.bfloat16 if use_bf16 else jnp.float32

    s_p = pad2d(s, Bp, Kp).astype(mm_dtype)
    w1_p = pad2d(w1, Kp, Hp).astype(mm_dtype)
    w2_p = pad2d(w2, Hp, Hp).astype(mm_dtype)
    wh_p = pad2d(wh, Hp, Op).astype(mm_dtype)
    # Biases stay f32: they are added to the f32 MXU accumulator.
    b1_p = pad2d(b1, 1, Hp).astype(jnp.float32)
    b2_p = pad2d(b2, 1, Hp).astype(jnp.float32)
    bh_p = pad2d(bh, 1, Op).astype(jnp.float32)

    vmem = pltpu.MemorySpace.VMEM
    batch_spec = pl.BlockSpec((TB, Kp), lambda i: (i, 0), memory_space=vmem)
    out_spec = pl.BlockSpec((TB, Op), lambda i: (i, 0), memory_space=vmem)

    def resident(shape):
        # Weights/biases stay resident in VMEM across the batch grid.
        return pl.BlockSpec(shape, lambda i: (0, 0), memory_space=vmem)

    out = pl.pallas_call(
        actor_beta_kernel,
        out_shape=jax.ShapeDtypeStruct((Bp, Op), jnp.float32),
        grid=(n_tiles,),
        in_specs=[
            batch_spec,
            resident((Kp, Hp)), resident((1, Hp)),
            resident((Hp, Hp)), resident((1, Hp)),
            resident((Hp, Op)), resident((1, Op)),
        ],
        out_specs=out_spec,
        compiler_params=pltpu.CompilerParams(
            dimension_semantics=("parallel",),
            vmem_limit_bytes=32 * 1024 * 1024,
        ),
    )(s_p, w1_p, b1_p, w2_p, b2_p, wh_p, bh_p)

    # Split the lane-dense fused output back into alpha / beta.
    alpha = out[:B, :A]
    beta = out[:B, A:2 * A]
    return alpha, beta


# ---------------------------------------------------------------------------
# Deterministic parameter init (mirrors orthogonal_init + zero bias).
# ---------------------------------------------------------------------------
def orthogonal_weight(key, in_dim, out_dim, gain=1.0, dtype=jnp.float32):
    # Returns W of shape [in_dim, out_dim] (transpose of PyTorch layout).
    a = jax.random.normal(key, (max(in_dim, out_dim), min(in_dim, out_dim)), dtype)
    q, r = jnp.linalg.qr(a)
    q = q * jnp.sign(jnp.diagonal(r))          # make decomposition unique
    if in_dim < out_dim:
        q = q.T                                # shape [in_dim, out_dim]
    q = q[:in_dim, :out_dim]
    return (gain * q).astype(dtype)


def init_actor_beta_params(key, state_dim, hidden_width, action_dim):
    k1, k2, k3, k4 = jax.random.split(key, 4)
    w1 = orthogonal_weight(k1, state_dim, hidden_width, gain=1.0)
    b1 = jnp.zeros((1, hidden_width), jnp.float32)
    w2 = orthogonal_weight(k2, hidden_width, hidden_width, gain=1.0)
    b2 = jnp.zeros((1, hidden_width), jnp.float32)
    wa = orthogonal_weight(k3, hidden_width, action_dim, gain=0.01)
    ba = jnp.zeros((1, action_dim), jnp.float32)
    wb = orthogonal_weight(k4, hidden_width, action_dim, gain=0.01)
    bb = jnp.zeros((1, action_dim), jnp.float32)
    return (w1, b1, w2, b2, wa, ba, wb, bb)


# Pure-JAX reference (for sanity checking the kernel).
def actor_beta_reference(s, params):
    w1, b1, w2, b2, wa, ba, wb, bb = params
    h = jnp.tanh(s @ w1 + b1)
    h = jnp.tanh(h @ w2 + b2)
    alpha = jax.nn.softplus(h @ wa + ba) + 1.0
    beta = jax.nn.softplus(h @ wb + bb) + 1.0
    return alpha, beta


if __name__ == "__main__":
    # Small shapes implied by the module's forward: s is [batch, state_dim].
    batch, state_dim, hidden_width, action_dim = 8, 16, 32, 4

    key = jax.random.PRNGKey(0)
    k_params, k_input = jax.random.split(key)

    params = init_actor_beta_params(k_params, state_dim, hidden_width, action_dim)
    s = jax.random.normal(k_input, (batch, state_dim), jnp.float32)

    alpha, beta = actor_beta_forward(s, params)
    alpha = jax.block_until_ready(alpha)
    beta = jax.block_until_ready(beta)

    # Sanity check against the pure-JAX reference.
    alpha_ref, beta_ref = actor_beta_reference(s, params)
    assert alpha.shape == (batch, action_dim) and beta.shape == (batch, action_dim)
    assert jnp.allclose(alpha, alpha_ref, atol=1e-5, rtol=1e-5)
    assert jnp.allclose(beta, beta_ref, atol=1e-5, rtol=1e-5)
    assert bool(jnp.all(alpha > 1.0)) and bool(jnp.all(beta > 1.0))

    print("KERNEL_OK")
</pallas_src>

<mosaic_0001>
module attributes {stable_mosaic.version = 11 : i64} {
  func.func @actor_beta_kernel(%arg0: i32, %arg1: memref<8x128xf32, #tpu.memory_space<vmem>>, %arg2: memref<128x128xf32, #tpu.memory_space<vmem>>, %arg3: memref<1x128xf32, #tpu.memory_space<vmem>>, %arg4: memref<128x128xf32, #tpu.memory_space<vmem>>, %arg5: memref<1x128xf32, #tpu.memory_space<vmem>>, %arg6: memref<128x128xf32, #tpu.memory_space<vmem>>, %arg7: memref<1x128xf32, #tpu.memory_space<vmem>>, %arg8: memref<8x128xf32, #tpu.memory_space<vmem>>) attributes {dimension_semantics = [#tpu.dimension_semantics<parallel>], iteration_bounds = array<i64: 1>, scalar_prefetch = 0 : i64, scratch_operands = 0 : i64, tpu.core_type = #tpu.core_type<tc>, window_params = [{transform_indices = @transform_0, window_bounds = array<i64: 8, 128>}, {pipeline_mode = #tpu.pipeline_mode<synchronous>, transform_indices = @transform_1, window_bounds = array<i64: 128, 128>}, {pipeline_mode = #tpu.pipeline_mode<synchronous>, transform_indices = @transform_2, window_bounds = array<i64: 1, 128>}, {pipeline_mode = #tpu.pipeline_mode<synchronous>, transform_indices = @transform_3, window_bounds = array<i64: 128, 128>}, {pipeline_mode = #tpu.pipeline_mode<synchronous>, transform_indices = @transform_4, window_bounds = array<i64: 1, 128>}, {pipeline_mode = #tpu.pipeline_mode<synchronous>, transform_indices = @transform_5, window_bounds = array<i64: 128, 128>}, {pipeline_mode = #tpu.pipeline_mode<synchronous>, transform_indices = @transform_6, window_bounds = array<i64: 1, 128>}, {transform_indices = @transform_7, window_bounds = array<i64: 8, 128>}]} {
    %c0 = arith.constant 0 : index
    %c0_0 = arith.constant 0 : index
    %0 = vector.load %arg1[%c0, %c0_0] : memref<8x128xf32, #tpu.memory_space<vmem>>, vector<8x128xf32>
    %c0_1 = arith.constant 0 : index
    %c0_2 = arith.constant 0 : index
    %1 = vector.load %arg2[%c0_1, %c0_2] : memref<128x128xf32, #tpu.memory_space<vmem>>, vector<128x128xf32>
    %cst = arith.constant dense<0.000000e+00> : vector<8x128xf32>
    %2 = tpu.matmul %0, %1, %cst {dimension_numbers = #tpu.dot_dimension_numbers<[1], [0], [0], [1], [0, 0, 1, 1], [], []>} : vector<8x128xf32>, vector<128x128xf32>, vector<8x128xf32> -> vector<8x128xf32>
    %c0_3 = arith.constant 0 : index
    %c0_4 = arith.constant 0 : index
    %3 = vector.load %arg3[%c0_3, %c0_4] : memref<1x128xf32, #tpu.memory_space<vmem>>, vector<1x128xf32>
    %4 = vector.broadcast %3 : vector<1x128xf32> to vector<8x128xf32>
    %5 = arith.addf %2, %4 : vector<8x128xf32>
    %6 = math.tanh %5 : vector<8x128xf32>
    %c0_5 = arith.constant 0 : index
    %c0_6 = arith.constant 0 : index
    %7 = vector.load %arg4[%c0_5, %c0_6] : memref<128x128xf32, #tpu.memory_space<vmem>>, vector<128x128xf32>
    %cst_7 = arith.constant dense<0.000000e+00> : vector<8x128xf32>
    %8 = tpu.matmul %6, %7, %cst_7 {dimension_numbers = #tpu.dot_dimension_numbers<[1], [0], [0], [1], [0, 0, 1, 1], [], []>} : vector<8x128xf32>, vector<128x128xf32>, vector<8x128xf32> -> vector<8x128xf32>
    %c0_8 = arith.constant 0 : index
    %c0_9 = arith.constant 0 : index
    %9 = vector.load %arg5[%c0_8, %c0_9] : memref<1x128xf32, #tpu.memory_space<vmem>>, vector<1x128xf32>
    %10 = vector.broadcast %9 : vector<1x128xf32> to vector<8x128xf32>
    %11 = arith.addf %8, %10 : vector<8x128xf32>
    %12 = math.tanh %11 : vector<8x128xf32>
    %c0_10 = arith.constant 0 : index
    %c0_11 = arith.constant 0 : index
    %13 = vector.load %arg6[%c0_10, %c0_11] : memref<128x128xf32, #tpu.memory_space<vmem>>, vector<128x128xf32>
    %cst_12 = arith.constant dense<0.000000e+00> : vector<8x128xf32>
    %14 = tpu.matmul %12, %13, %cst_12 {dimension_numbers = #tpu.dot_dimension_numbers<[1], [0], [0], [1], [0, 0, 1, 1], [], []>} : vector<8x128xf32>, vector<128x128xf32>, vector<8x128xf32> -> vector<8x128xf32>
    %c0_13 = arith.constant 0 : index
    %c0_14 = arith.constant 0 : index
    %15 = vector.load %arg7[%c0_13, %c0_14] : memref<1x128xf32, #tpu.memory_space<vmem>>, vector<1x128xf32>
    %16 = vector.broadcast %15 : vector<1x128xf32> to vector<8x128xf32>
    %17 = arith.addf %14, %16 : vector<8x128xf32>
    %cst_15 = arith.constant 0.000000e+00 : f32
    %18 = vector.broadcast %cst_15 : f32 to vector<8x128xf32>
    %19 = arith.maximumf %17, %18 : vector<8x128xf32>
    %20 = math.absf %17 : vector<8x128xf32>
    %cst_16 = arith.constant 0.000000e+00 : f32
    %21 = vector.broadcast %cst_16 : f32 to vector<8x128xf32>
    %22 = arith.subf %21, %20 : vector<8x128xf32>
    %23 = math.exp %22 : vector<8x128xf32>
    %24 = math.log1p %23 : vector<8x128xf32>
    %25 = arith.addf %19, %24 : vector<8x128xf32>
    %cst_17 = arith.constant 1.000000e+00 : f32
    %26 = vector.broadcast %cst_17 : f32 to vector<8x128xf32>
    %27 = arith.addf %25, %26 : vector<8x128xf32>
    %c0_18 = arith.constant 0 : index
    %c0_19 = arith.constant 0 : index
    %28 = vector.load %arg8[%c0_18, %c0_19] : memref<8x128xf32, #tpu.memory_space<vmem>>, vector<8x128xf32>
    tpu.vector_store %arg8[%c0_18, %c0_19], %27 {strides = array<i32>} : memref<8x128xf32, #tpu.memory_space<vmem>>, vector<8x128xf32>,
    return
  }
  func.func @transform_0(%arg0: i32) -> (i32, i32) {
    %c0_i32 = arith.constant 0 : i32
    %c0_i32_0 = arith.constant 0 : i32
    return %arg0, %c0_i32 : i32, i32
  }
  func.func @transform_1(%arg0: i32) -> (i32, i32) {
    %c0_i32 = arith.constant 0 : i32
    %c0_i32_0 = arith.constant 0 : i32
    %c0_i32_1 = arith.constant 0 : i32
    return %c0_i32, %c0_i32_0 : i32, i32
  }
  func.func @transform_2(%arg0: i32) -> (i32, i32) {
    %c0_i32 = arith.constant 0 : i32
    %c0_i32_0 = arith.constant 0 : i32
    %c0_i32_1 = arith.constant 0 : i32
    return %c0_i32, %c0_i32_0 : i32, i32
  }
  func.func @transform_3(%arg0: i32) -> (i32, i32) {
    %c0_i32 = arith.constant 0 : i32
    %c0_i32_0 = arith.constant 0 : i32
    %c0_i32_1 = arith.constant 0 : i32
    return %c0_i32, %c0_i32_0 : i32, i32
  }
  func.func @transform_4(%arg0: i32) -> (i32, i32) {
    %c0_i32 = arith.constant 0 : i32
    %c0_i32_0 = arith.constant 0 : i32
    %c0_i32_1 = arith.constant 0 : i32
    return %c0_i32, %c0_i32_0 : i32, i32
  }
  func.func @transform_5(%arg0: i32) -> (i32, i32) {
    %c0_i32 = arith.constant 0 : i32
    %c0_i32_0 = arith.constant 0 : i32
    %c0_i32_1 = arith.constant 0 : i32
    return %c0_i32, %c0_i32_0 : i32, i32
  }
  func.func @transform_6(%arg0: i32) -> (i32, i32) {
    %c0_i32 = arith.constant 0 : i32
    %c0_i32_0 = arith.constant 0 : i32
    %c0_i32_1 = arith.constant 0 : i32
    return %c0_i32, %c0_i32_0 : i32, i32
  }
  func.func @transform_7(%arg0: i32) -> (i32, i32) {
    %c0_i32 = arith.constant 0 : i32
    %c0_i32_0 = arith.constant 0 : i32
    return %arg0, %c0_i32 : i32, i32
  }
}

</mosaic_0001>

<bundles_post_ra>
// kernel: actor_beta_forward.1
= control target key start
LH: loop header
LB: loop body
LE: loop exit
PB: predicated region body
PF: predicated region fallthrough
CT: control target
= control target key end

     0   :  { %v498_v0 = vmov 0.0   ;;  %vm499_vm0 = vmmov 0   ;;  %s753_s1 = inlined_call_operand.vmem [shape: f32[128,128], index: 1, kind: input, shape index: {}]   ;;  %s754_s3 = inlined_call_operand.vmem [shape: f32[128,128], index: 3, kind: input, shape index: {}]   ;;  %s755_s0 = inlined_call_operand.vmem [shape: f32[8,128], index: 0, kind: input, shape index: {}]   ;;  %s756_s5 = inlined_call_operand.vmem [shape: f32[128,128], index: 5, kind: input, shape index: {}]   ;;  %s757_s2 = inlined_call_operand.vmem [shape: f32[1,128], index: 2, kind: input, shape index: {}]   ;;  %s758_s4 = inlined_call_operand.vmem [shape: f32[1,128], index: 4, kind: input, shape index: {}]   ;;  %s759_s6 = inlined_call_operand.vmem [shape: f32[1,128], index: 6, kind: input, shape index: {}]   ;;  %s760_s7 = inlined_call_operand.vmem [shape: f32[8,128], index: 7, kind: output, shape index: {}]  }
   0x1   :  { %383 = vmatprep.subr.mxu0 %v498_v0  ;;  %v42_v1 = vld [vmem:[%s753_s1 + $0x78] sm:$0xff]  ;;  %v41_v2 = vld [vmem:[%s753_s1 + $0x70] sm:$0xff]  ;;  %415 = vmatprep.mubr.msk.f32.mxu0 %vm499_vm0, %v498_v0  ;;  %v40_v3 = vld [vmem:[%s753_s1 + $0x68] sm:$0xff] }
   0x2   :  { %384 = vmatpush3.msra.mxu0 %v42_v1  ;;  %418 = vmatprep.subr.mxu1 %v498_v0  ;;  %v39_v4 = vld [vmem:[%s753_s1 + $0x60] sm:$0xff]  ;;  %v136_v5 = vld [vmem:[%s754_s3 + $0x78] sm:$0xff]  ;;  %v135_v7 = vld [vmem:[%s754_s3 + $0x70] sm:$0xff] }
   0x3   :  { %385 = vmatprep.subr.mxu0 %v498_v0  ;;  %450 = vmatprep.mubr.msk.f32.mxu1 %vm499_vm0, %v498_v0  ;;  %v38_v6 = vld [vmem:[%s753_s1 + $0x58] sm:$0xff]  ;;  %v134_v8 = vld [vmem:[%s754_s3 + $0x68] sm:$0xff]  ;;  %v37_v9 = vld [vmem:[%s753_s1 + $0x50] sm:$0xff] }
   0x4   :  { %386 = vmatpush3.msra.mxu0 %v41_v2  ;;  %419 = vmatpush3.msra.mxu1 %v136_v5  ;;  %v133_v10 = vld [vmem:[%s754_s3 + $0x60] sm:$0xff]  ;;  %v36_v11 = vld [vmem:[%s753_s1 + $0x48] sm:$0xff]  ;;  %v132_v12 = vld [vmem:[%s754_s3 + $0x58] sm:$0xff] }
   0x5   :  { %387 = vmatprep.subr.mxu0 %v498_v0  ;;  %420 = vmatprep.subr.mxu1 %v498_v0  ;;  %v35_v13 = vld [vmem:[%s753_s1 + $0x40] sm:$0xff]  ;;  %v131_v14 = vld [vmem:[%s754_s3 + $0x50] sm:$0xff]  ;;  %v34_v15 = vld [vmem:[%s753_s1 + $0x38] sm:$0xff] }
   0x6   :  { %388 = vmatpush3.msra.mxu0 %v40_v3  ;;  %421 = vmatpush3.msra.mxu1 %v135_v7  ;;  %v130_v16 = vld [vmem:[%s754_s3 + $0x48] sm:$0xff]  ;;  %v33_v17 = vld [vmem:[%s753_s1 + $0x30] sm:$0xff]  ;;  %v31_v19 = vld [vmem:[%s753_s1 + $0x20] sm:$0xff] }
   0x7   :  { %389 = vmatprep.subr.mxu0 %v498_v0  ;;  %422 = vmatprep.subr.mxu1 %v498_v0  ;;  %v32_v18 = vld [vmem:[%s753_s1 + $0x28] sm:$0xff]  ;;  %v30_v20 = vld [vmem:[%s753_s1 + $0x18] sm:$0xff]  ;;  %v29_v21 = vld [vmem:[%s753_s1 + $0x10] sm:$0xff] }
   0x8   :  { %390 = vmatpush3.msra.mxu0 %v39_v4  ;;  %423 = vmatpush3.msra.mxu1 %v134_v8  ;;  %v28_v22 = vld [vmem:[%s753_s1 + $0x8] sm:$0xff]  ;;  %v27_v23 = vld [vmem:[%s753_s1] sm:$0xff]  ;;  %v128_v26 = vld [vmem:[%s754_s3 + $0x38] sm:$0xff] }
   0x9   :  { %391 = vmatprep.subr.mxu0 %v498_v0  ;;  %424 = vmatprep.subr.mxu1 %v498_v0  ;;  %v26_v24 = vld [vmem:[%s755_s0] sm:$0xff]  ;;  %v127_v27 = vld [vmem:[%s754_s3 + $0x30] sm:$0xff]  ;;  %v126_v28 = vld [vmem:[%s754_s3 + $0x28] sm:$0xff] }
   0xa   :  { %392 = vmatpush3.msra.mxu0 %v38_v6  ;;  %425 = vmatpush3.msra.mxu1 %v133_v10  ;;  %v129_v25 = vld [vmem:[%s754_s3 + $0x40] sm:$0xff]  ;;  %v124_v30 = vld [vmem:[%s754_s3 + $0x18] sm:$0xff]  ;;  %v123_v31 = vld [vmem:[%s754_s3 + $0x10] sm:$0xff] }
   0xb   :  { %393 = vmatprep.subr.mxu0 %v498_v0  ;;  %426 = vmatprep.subr.mxu1 %v498_v0  ;;  %v125_v29 = vld [vmem:[%s754_s3 + $0x20] sm:$0xff]  ;;  %v122_v32 = vld [vmem:[%s754_s3 + $0x8] sm:$0xff]  ;;  %v230_v34 = vld [vmem:[%s756_s5 + $0x78] sm:$0xff] }
   0xc   :  { %394 = vmatpush3.msra.mxu0 %v37_v9  ;;  %427 = vmatpush3.msra.mxu1 %v132_v12  ;;  %v121_v33 = vld [vmem:[%s754_s3] sm:$0xff]  ;;  %v229_v35 = vld [vmem:[%s756_s5 + $0x70] sm:$0xff]  ;;  %v228_v36 = vld [vmem:[%s756_s5 + $0x68] sm:$0xff] }
   0xd   :  { %395 = vmatprep.subr.mxu0 %v498_v0  ;;  %428 = vmatprep.subr.mxu1 %v498_v0  ;;  %v227_v37 = vld [vmem:[%s756_s5 + $0x60] sm:$0xff]  ;;  %v226_v38 = vld [vmem:[%s756_s5 + $0x58] sm:$0xff]  ;;  %v225_v39 = vld [vmem:[%s756_s5 + $0x50] sm:$0xff] }
   0xe   :  { %396 = vmatpush3.msra.mxu0 %v36_v11  ;;  %429 = vmatpush3.msra.mxu1 %v131_v14  ;;  %v224_v40 = vld [vmem:[%s756_s5 + $0x48] sm:$0xff]  ;;  %v329_v41 = vld [vmem:[%s757_s2] ss:$0 sm:$0xff]  ;;  %v222_v47 = vld [vmem:[%s756_s5 + $0x38] sm:$0xff] }
   0xf   :  { %397 = vmatprep.subr.mxu0 %v498_v0  ;;  %430 = vmatprep.subr.mxu1 %v498_v0  ;;  %v223_v46 = vld [vmem:[%s756_s5 + $0x40] sm:$0xff]  ;;  %v221_v48 = vld [vmem:[%s756_s5 + $0x30] sm:$0xff]  ;;  %v220_v49 = vld [vmem:[%s756_s5 + $0x28] sm:$0xff] }
  0x10   :  { %398 = vmatpush3.msra.mxu0 %v35_v13  ;;  %431 = vmatpush3.msra.mxu1 %v130_v16  ;;  %v219_v50 = vld [vmem:[%s756_s5 + $0x20] sm:$0xff]  ;;  %v218_v51 = vld [vmem:[%s756_s5 + $0x18] sm:$0xff]  ;;  %v217_v52 = vld [vmem:[%s756_s5 + $0x10] sm:$0xff] }
  0x11   :  { %399 = vmatprep.subr.mxu0 %v498_v0  ;;  %432 = vmatprep.subr.mxu1 %v498_v0  ;;  %v216_v53 = vld [vmem:[%s756_s5 + $0x8] sm:$0xff]  ;;  %v215_v54 = vld [vmem:[%s756_s5] sm:$0xff] }
  0x12   :  { %400 = vmatpush3.msra.mxu0 %v34_v15  ;;  %433 = vmatpush3.msra.mxu1 %v129_v25  ;;  %v330_v55 = vld [vmem:[%s758_s4] ss:$0 sm:$0xff] }
  0x13   :  { %401 = vmatprep.subr.mxu0 %v498_v0  ;;  %434 = vmatprep.subr.mxu1 %v498_v0  ;;  %v331_v60 = vld [vmem:[%s759_s6] ss:$0 sm:$0xff] }
  0x14   :  { %402 = vmatpush3.msra.mxu0 %v33_v17  ;;  %435 = vmatpush3.msra.mxu1 %v128_v26 }
  0x15   :  { %403 = vmatprep.subr.mxu0 %v498_v0  ;;  %436 = vmatprep.subr.mxu1 %v498_v0 }
  0x16   :  { %404 = vmatpush3.msra.mxu0 %v32_v18  ;;  %437 = vmatpush3.msra.mxu1 %v127_v27 }
  0x17   :  { %405 = vmatprep.subr.mxu0 %v498_v0  ;;  %438 = vmatprep.subr.mxu1 %v498_v0 }
  0x18   :  { %406 = vmatpush3.msra.mxu0 %v31_v19  ;;  %439 = vmatpush3.msra.mxu1 %v126_v28 }
  0x19   :  { %407 = vmatprep.subr.mxu0 %v498_v0  ;;  %440 = vmatprep.subr.mxu1 %v498_v0 }
  0x1a   :  { %408 = vmatpush3.msra.mxu0 %v30_v20  ;;  %441 = vmatpush3.msra.mxu1 %v125_v29 }
  0x1b   :  { %409 = vmatprep.subr.mxu0 %v498_v0  ;;  %442 = vmatprep.subr.mxu1 %v498_v0 }
  0x1c   :  { %410 = vmatpush3.msra.mxu0 %v29_v21  ;;  %443 = vmatpush3.msra.mxu1 %v124_v30 }
  0x1d   :  { %411 = vmatprep.subr.mxu0 %v498_v0  ;;  %444 = vmatprep.subr.mxu1 %v498_v0 }
  0x1e   :  { %412 = vmatpush3.msra.mxu0 %v28_v22  ;;  %445 = vmatpush3.msra.mxu1 %v123_v31 }
  0x1f   :  { %413 = vmatprep.subr.mxu0 %v498_v0  ;;  %446 = vmatprep.subr.mxu1 %v498_v0 }
  0x20   :  { %414 = vmatpush3.msra.mxu0 %v27_v23  ;;  %447 = vmatpush3.msra.mxu1 %v122_v32 }
  0x21   :  { %416 = vmatmul.mubr.f32.vlgmr.msra.gmra.mxu0 %v26_v24  ;;  %453 = vmatprep.subr.mxu0 %v498_v0 }
  0x22   :  { %485 = vmatprep.mubr.msk.f32.mxu0 %vm499_vm0, %v498_v0  ;;  %448 = vmatprep.subr.mxu1 %v498_v0 }
  0x23   :  { %449 = vmatpush3.msra.mxu1 %v121_v33  ;;  %454 = vmatpush3.msra.mxu0 %v230_v34 }
  0x24   :  { %455 = vmatprep.subr.mxu0 %v498_v0 }
  0x25   :  { %456 = vmatpush3.msra.mxu0 %v229_v35 }
  0x26   :  { %457 = vmatprep.subr.mxu0 %v498_v0 }
  0x27   :  { %458 = vmatpush3.msra.mxu0 %v228_v36 }
  0x28   :  { %459 = vmatprep.subr.mxu0 %v498_v0 }
  0x29   :  { %460 = vmatpush3.msra.mxu0 %v227_v37 }
  0x2a   :  { %461 = vmatprep.subr.mxu0 %v498_v0 }
  0x2b   :  { %462 = vmatpush3.msra.mxu0 %v226_v38 }
  0x2c   :  { %463 = vmatprep.subr.mxu0 %v498_v0 }
  0x2d   :  { %464 = vmatpush3.msra.mxu0 %v225_v39 }
  0x2e   :  { %465 = vmatprep.subr.mxu0 %v498_v0 }
  0x2f   :  { %466 = vmatpush3.msra.mxu0 %v224_v40 }
  0x30   :  { %467 = vmatprep.subr.mxu0 %v498_v0 }
  0x31   :  { %468 = vmatpush3.msra.mxu0 %v223_v46 }
  0x32   :  { %469 = vmatprep.subr.mxu0 %v498_v0 }
  0x33   :  { %470 = vmatpush3.msra.mxu0 %v222_v47 }
  0x34   :  { %471 = vmatprep.subr.mxu0 %v498_v0 }
  0x35   :  { %472 = vmatpush3.msra.mxu0 %v221_v48 }
  0x36   :  { %473 = vmatprep.subr.mxu0 %v498_v0 }
  0x37   :  { %474 = vmatpush3.msra.mxu0 %v220_v49 }
  0x38   :  { %475 = vmatprep.subr.mxu0 %v498_v0 }
  0x39   :  { %476 = vmatpush3.msra.mxu0 %v219_v50 }
  0x3a   :  { %477 = vmatprep.subr.mxu0 %v498_v0 }
  0x3b   :  { %478 = vmatpush3.msra.mxu0 %v218_v51 }
  0x3c   :  { %479 = vmatprep.subr.mxu0 %v498_v0 }
  0x3d   :  { %480 = vmatpush3.msra.mxu0 %v217_v52 }
  0x3e   :  { %481 = vmatprep.subr.mxu0 %v498_v0 }
  0x3f   :  { %482 = vmatpush3.msra.mxu0 %v216_v53 }
  0x40   :  { %483 = vmatprep.subr.mxu0 %v498_v0 }
  0x41   :  { %484 = vmatpush3.msra.mxu0 %v215_v54 }
  0xe1   :  { %v116_v42 = vpop.f32.mrf.mxu0 }
  0xe2   :  { %v117_v43 = vadd.f32 %v329_v41, %v116_v42 }
  0xe3   :  { %v417_v44 = vpop.f32.mrf.mxu0 }
  0xe4   :  { %490 = vtanh.f32 %v117_v43 }
  0xf1   :  { %v491_v45 = vpop.eup %490 }
  0xf2   :  { %451 = vmatmul.mubr.f32.vlgmr.msra.gmra.mxu1 %v491_v45 }
 0x1b2   :  { %v210_v56 = vpop.f32.mrf.mxu1 }
 0x1b3   :  { %v211_v57 = vadd.f32 %v330_v55, %v210_v56 }
 0x1b4   :  { %v452_v58 = vpop.f32.mrf.mxu1 }
 0x1b5   :  { %492 = vtanh.f32 %v211_v57 }
 0x1c2   :  { %v493_v59 = vpop.eup %492 }
 0x1c3   :  { %486 = vmatmul.mubr.f32.vlgmr.msra.gmra.mxu0 %v493_v59 }
 0x283   :  { %v304_v61 = vpop.f32.mrf.mxu0 }
 0x284   :  { %v305_v62 = vadd.f32 %v331_v60, %v304_v61 }
 0x285   :  { %v487_v63 = vpop.f32.mrf.mxu0 }
 0x286   :  { %v309_v1 = vand.u32 2147483647, %v305_v62  ;;  %v308_v11 = vmax.f32 %v305_v62, 0.0 }
 0x288   :  { %v310_v0 = vsub.f32 0.0, %v309_v1 }
 0x28a   :  { %v311_v2 = vmul.f32 1.442695, %v310_v0 }
 0x28c   :  { %494 = vpow2.f32 %v311_v2 }
 0x299   :  { %v495_v3 = vpop.eup %494 }
 0x29a   :  { %v313_v4 = vadd.f32 1.0, %v495_v3  ;;  %v316_v5 = vmul.f32 -0.5, %v495_v3  ;;  %v319_v7 = vand.u32 2147483647, %v495_v3 }
 0x29c   :  { %496 = vlog2.f32 %v313_v4  ;;  %v317_v6 = vadd.f32 1.0, %v316_v5  ;;  %vm320_vm1 = vcmp.lt.f32.partialorder %v319_v7, 0.0004427343 }
 0x29e   :  { %v318_v10 = vmul.f32 %v495_v3, %v317_v6 }
 0x2a9   :  { %v497_v8 = vpop.eup %496 }
 0x2aa   :  { %v315_v9 = vmul.f32 0.6931472, %v497_v8 }
 0x2ac   :  { %v321_v12 = vsel %vm320_vm1, %v318_v10, %v315_v9 }
 0x2ad   :  { %v322_v13 = vadd.f32 %v321_v12, %v308_v11 }
 0x2af   :  { %v323_v14 = vadd.f32 1.0, %v322_v13 }
 0x2b1   :  { %324 = vst [vmem:[%s760_s7] sm:$0xff] %v323_v14 }

</bundles_post_ra>
